<compile_context>
chip_gen: v7x
topology: tpu7x:2x2x1
jax: 0.10.0
libtpu: 0.0.40
codegen_flags: <defaults>
</compile_context>

<pallas_src>
import functools

import jax
import jax.numpy as jnp
from jax import lax
from jax.experimental import pallas as pl
from jax.experimental.pallas import tpu as pltpu


# --------------------------------------------------------------------------- #
# helpers
# --------------------------------------------------------------------------- #
def _round_up(x, m):
    return ((x + m - 1) // m) * m


def _fold_bn(bn_params, cout, eps):
    """Eval-mode BatchNorm folded to per-channel (scale, bias)."""
    if bn_params is None:
        return jnp.ones((cout,), jnp.float32), jnp.zeros((cout,), jnp.float32)
    gamma, beta, mean, var = (jnp.asarray(p, jnp.float32) for p in bn_params)
    scale = gamma * lax.rsqrt(var + eps)
    bias = beta - mean * scale
    return scale, bias


def hs_branch_channels(in_planes, s=4):
    """Per-branch channel counts, exactly as HSBlock_rfb.__init__ computes them."""
    in_ch, in_ch_last = ((in_planes // s, in_planes // s) if in_planes % s == 0
                         else (in_planes // s + 1, in_planes % s))
    chans = []
    acc = 0
    for i in range(1, s):
        if i == 1:
            ch = in_ch
            acc = ch // 2
        elif i == s - 1:
            ch = in_ch_last + acc
        else:
            ch = in_ch + acc
            acc = ch // 2
        chans.append(ch)
    return chans


# --------------------------------------------------------------------------- #
# Pallas kernel 1: fused (im2col-matmul) + BN-folded bias + ReLU
# --------------------------------------------------------------------------- #
def _matmul_bias_relu_kernel(x_ref, w_ref, b_ref, o_ref, *, apply_relu):
    # x_ref: (TILE_R, KKC_PAD)   bf16 im2col row tile (lane-dense, 128-padded depth)
    # w_ref: (KKC_PAD, COUT_PAD) bf16 BN-folded weights (resident)
    # b_ref: (1, COUT_PAD)       f32 folded BN bias (resident)
    # o_ref: (TILE_R, COUT_PAD)  bf16 output row tile
    acc = jnp.dot(x_ref[...], w_ref[...], preferred_element_type=jnp.float32)
    y = acc + b_ref[...]
    if apply_relu:
        y = jnp.maximum(y, 0.0)
    o_ref[...] = y.astype(o_ref.dtype)


def conv_bn_relu_pallas_nhwc(x_nhwc, weight_oihw, *, stride=1, padding=0,
                             dilation=1, bn_params=None, relu=True, eps=1e-5,
                             tile_rows=512):
    """Fused Conv2d(bias=False)+BN(eval)+ReLU.  NHWC bf16 in / NHWC bf16 out."""
    N, H, W, Cin = x_nhwc.shape
    Cout, Cin_w, KH, KW = weight_oihw.shape
    assert Cin == Cin_w  # TODO(synk): groups > 1 not implemented (module default groups=1)

    # Fold eval-mode BN into the weights; only a bias add remains in-kernel.
    scale, bias = _fold_bn(bn_params, Cout, eps)
    w_f = weight_oihw.astype(jnp.float32) * scale[:, None, None, None]

    # bf16 BEFORE any padding / slab building so wrapper data movement is half-size.
    x = x_nhwc.astype(jnp.bfloat16)
    if padding:
        x = jnp.pad(x, ((0, 0), (padding, padding), (padding, padding), (0, 0)))
    Hp, Wp = H + 2 * padding, W + 2 * padding
    Ho = (Hp - dilation * (KH - 1) - 1) // stride + 1
    Wo = (Wp - dilation * (KW - 1) - 1) // stride + 1

    # Wrapper-side im2col: static strided slices (no gather), bf16.
    taps = []
    for kh in range(KH):
        for kw in range(KW):
            h0, w0 = kh * dilation, kw * dilation
            taps.append(x[:, h0:h0 + (Ho - 1) * stride + 1:stride,
                          w0:w0 + (Wo - 1) * stride + 1:stride, :])
    patches = jnp.concatenate(taps, axis=-1)              # (N, Ho, Wo, KH*KW*Cin)

    KKC = KH * KW * Cin
    KKC_PAD = _round_up(KKC, 128)
    COUT_PAD = _round_up(Cout, 128)

    R = N * Ho * Wo
    lhs = patches.reshape(R, KKC)
    if KKC_PAD > KKC:
        lhs = jnp.pad(lhs, ((0, 0), (0, KKC_PAD - KKC)))  # aligned contraction feed

    # Row tile: >=512 rows preferred, bounded by a VMEM budget for the
    # double-buffered in/out tiles (keeps big shapes safe on v7x's 64 MiB).
    bytes_per_row = 2 * KKC_PAD * 2 + 2 * COUT_PAD * 2 + COUT_PAD * 4
    TILE_R = min(tile_rows, _round_up(R, 8),
                 max(8, (24 * 1024 * 1024) // max(1, bytes_per_row)))
    TILE_R = max(8, (TILE_R // 8) * 8)
    R_PAD = _round_up(R, TILE_R)
    if R_PAD > R:
        lhs = jnp.pad(lhs, ((0, R_PAD - R), (0, 0)))

    # Weights -> (KKC_PAD, COUT_PAD) bf16, bias -> (1, COUT_PAD) f32 (lane-dense).
    w_mat = jnp.transpose(w_f, (2, 3, 1, 0)).reshape(KKC, Cout)
    w_mat = jnp.pad(w_mat, ((0, KKC_PAD - KKC), (0, COUT_PAD - Cout))).astype(jnp.bfloat16)
    b_row = jnp.pad(bias, (0, COUT_PAD - Cout)).reshape(1, COUT_PAD).astype(jnp.float32)

    # Derived per-step VMEM footprint (double-buffered lhs/out + resident w/b + f32 acc).
    step_bytes = (2 * TILE_R * KKC_PAD * 2 + 2 * TILE_R * COUT_PAD * 2
                  + KKC_PAD * COUT_PAD * 2 + COUT_PAD * 4 + TILE_R * COUT_PAD * 4)
    assert step_bytes <= 56 * 1024 * 1024, ("conv tile exceeds v7x VMEM budget", step_bytes)
    vmem_limit = int(min(max(2 * step_bytes, 4 * 1024 * 1024), 60 * 1024 * 1024))

    cost = pl.CostEstimate(
        flops=int(2 * R * KKC * Cout),                    # real flops, not padded
        transcendentals=0,
        bytes_accessed=int(R_PAD * KKC_PAD * 2 + KKC_PAD * COUT_PAD * 2
                           + COUT_PAD * 4 + R_PAD * COUT_PAD * 2),
    )

    out = pl.pallas_call(
        functools.partial(_matmul_bias_relu_kernel, apply_relu=relu),
        out_shape=jax.ShapeDtypeStruct((R_PAD, COUT_PAD), jnp.bfloat16),
        grid=(R_PAD // TILE_R,),
        in_specs=[
            pl.BlockSpec((TILE_R, KKC_PAD), lambda i: (i, 0)),
            pl.BlockSpec((KKC_PAD, COUT_PAD), lambda i: (0, 0)),   # resident weights
            pl.BlockSpec((1, COUT_PAD), lambda i: (0, 0)),         # resident bias
        ],
        out_specs=pl.BlockSpec((TILE_R, COUT_PAD), lambda i: (i, 0)),
        compiler_params=pltpu.CompilerParams(
            dimension_semantics=("parallel",),
            vmem_limit_bytes=vmem_limit),
        cost_estimate=cost,
    )(lhs, w_mat, b_row)

    return out[:R, :Cout].reshape(N, Ho, Wo, Cout)        # NHWC bf16


# --------------------------------------------------------------------------- #
# Pallas kernel 2: fused BatchNorm2d(eval) + ReLU epilogue (lane-dense NHWC view)
# --------------------------------------------------------------------------- #
def _bn_relu_kernel(x_ref, s_ref, b_ref, o_ref, *, apply_relu):
    y = x_ref[...].astype(jnp.float32) * s_ref[...] + b_ref[...]
    if apply_relu:
        y = jnp.maximum(y, 0.0)
    o_ref[...] = y.astype(o_ref.dtype)


def bn_relu_pallas_nhwc(x_nhwc, *, bn_params=None, relu=True, eps=1e-5,
                        out_dtype=jnp.float32, tile_rows=512):
    N, H, W, C = x_nhwc.shape
    scale, bias = _fold_bn(bn_params, C, eps)
    R, L = N * H, W * C
    x2 = x_nhwc.reshape(R, L)                              # lane-dense, no transpose
    s_row = jnp.tile(scale, W).reshape(1, L).astype(jnp.float32)   # resident rows
    b_row = jnp.tile(bias, W).reshape(1, L).astype(jnp.float32)

    bytes_per_row = L * 12                                 # bf16 in + f32 tmp + out (dbl-buffered ish)
    TR = min(tile_rows, _round_up(R, 8),
             max(8, (8 * 1024 * 1024) // max(1, bytes_per_row)))
    TR = max(8, (TR // 8) * 8)
    Rp = _round_up(R, TR)
    if Rp > R:
        x2 = jnp.pad(x2, ((0, Rp - R), (0, 0)))

    out = pl.pallas_call(
        functools.partial(_bn_relu_kernel, apply_relu=relu),
        out_shape=jax.ShapeDtypeStruct((Rp, L), out_dtype),
        grid=(Rp // TR,),
        in_specs=[pl.BlockSpec((TR, L), lambda i: (i, 0)),
                  pl.BlockSpec((1, L), lambda i: (0, 0)),
                  pl.BlockSpec((1, L), lambda i: (0, 0))],
        out_specs=pl.BlockSpec((TR, L), lambda i: (i, 0)),
        compiler_params=pltpu.CompilerParams(dimension_semantics=("parallel",)),
    )(x2, s_row, b_row)
    return out[:R].reshape(N, H, W, C)


# --------------------------------------------------------------------------- #
# BasicConv_hs forward (Pallas path): NHWC bf16 end-to-end between branches
# --------------------------------------------------------------------------- #
def basic_conv_hs_pallas(x_nchw, branch_params, final_bn, *, s=4, stride=1,
                         padding=0, dilation=1, relu=True, eps=1e-5):
    orig_dtype = x_nchw.dtype
    N, C, H, W = x_nchw.shape
    assert C % s == 0  # TODO(synk): torch.chunk remainder handling for C % s != 0
    # Single entry transpose + bf16 cast; everything between branches stays NHWC bf16.
    x = jnp.transpose(x_nchw, (0, 2, 3, 1)).astype(jnp.bfloat16)
    cs = C // s
    xs = [x[..., i * cs:(i + 1) * cs] for i in range(s)]

    for i in range(1, s):
        w, bnp = branch_params[i - 1]
        y = conv_bn_relu_pallas_nhwc(xs[i], w, stride=stride, padding=padding,
                                     dilation=dilation, bn_params=bnp, relu=True,
                                     eps=eps)
        if i == s - 1:
            xs[0] = jnp.concatenate([xs[0], y], axis=-1)
        else:
            ch = y.shape[-1]
            split = ch - ch // 2          # torch.chunk(2, dim=1): first chunk = ceil half
            xs[0] = jnp.concatenate([xs[0], y[..., :split]], axis=-1)
            xs[i + 1] = jnp.concatenate([xs[i + 1], y[..., split:]], axis=-1)

    y = xs[0]
    y = bn_relu_pallas_nhwc(y, bn_params=final_bn, relu=relu, eps=eps,
                            out_dtype=orig_dtype)
    return jnp.transpose(y, (0, 3, 1, 2))                  # single exit transpose


# --------------------------------------------------------------------------- #
# pure-JAX reference: independent NCHW plumbing mirroring the PyTorch forward,
# with the same bf16 MXU-input / inter-branch activation quantization.
# --------------------------------------------------------------------------- #
def _torch_chunk(x, chunks, axis):
    size = -(-x.shape[axis] // chunks)
    out, off = [], 0
    while off < x.shape[axis]:
        c = min(size, x.shape[axis] - off)
        out.append(lax.slice_in_dim(x, off, off + c, axis=axis))
        off += c
    return out


def conv_bn_relu_ref(x, w, *, stride=1, padding=0, dilation=1, bn_params=None,
                     relu=True, eps=1e-5):
    cout = w.shape[0]
    scale, bias = _fold_bn(bn_params, cout, eps)
    w_f = w.astype(jnp.float32) * scale[:, None, None, None]
    xq = x.astype(jnp.bfloat16).astype(jnp.float32)
    wq = w_f.astype(jnp.bfloat16).astype(jnp.float32)
    y = lax.conv_general_dilated(
        xq, wq, window_strides=(stride, stride),
        padding=[(padding, padding), (padding, padding)],
        rhs_dilation=(dilation, dilation),
        dimension_numbers=("NCHW", "OIHW", "NCHW"),
        precision=lax.Precision.HIGHEST,
        preferred_element_type=jnp.float32)
    y = y + bias[None, :, None, None]
    if relu:
        y = jnp.maximum(y, 0.0)
    return y


def basic_conv_hs_ref(x, branch_params, final_bn, *, s=4, stride=1, padding=0,
                      dilation=1, relu=True, eps=1e-5):
    xs = _torch_chunk(x, s, axis=1)
    # mirror the Pallas path's bf16 inter-branch activations
    xs = [a.astype(jnp.bfloat16).astype(jnp.float32) for a in xs]
    for i in range(1, s):
        w, bnp = branch_params[i - 1]
        y = conv_bn_relu_ref(xs[i], w, stride=stride, padding=padding,
                             dilation=dilation, bn_params=bnp, relu=True, eps=eps)
        y = y.astype(jnp.bfloat16).astype(jnp.float32)
        if i == s - 1:
            xs[0] = jnp.concatenate([xs[0], y], axis=1)
        else:
            ch = y.shape[1]
            sp = -(-ch // 2)              # torch.chunk(2): ceil half
            xs[0] = jnp.concatenate([xs[0], y[:, :sp]], axis=1)
            xs[i + 1] = jnp.concatenate([xs[i + 1], y[:, sp:]], axis=1)
    y = xs[0]
    if final_bn is not None:
        scale, bias = _fold_bn(final_bn, y.shape[1], eps)
        y = y * scale[None, :, None, None] + bias[None, :, None, None]
    if relu:
        y = jnp.maximum(y, 0.0)
    return y


# --------------------------------------------------------------------------- #
if __name__ == "__main__":
    # BasicConv_hs(in_planes=16, out_planes=16, kernel_size=3, stride=1, padding=1)
    N, C, H, W = 2, 16, 16, 16
    s, k, stride, padding, dilation = 4, 3, 1, 1, 1

    keys = iter(jax.random.split(jax.random.PRNGKey(0), 64))
    x = jax.random.normal(next(keys), (N, C, H, W), jnp.float32)

    branch_params = []
    for ch in hs_branch_channels(C, s):            # [4, 6, 7] for in_planes=16
        w = jax.random.normal(next(keys), (ch, ch, k, k), jnp.float32) * 0.1
        gamma = 1.0 + 0.1 * jax.random.normal(next(keys), (ch,), jnp.float32)
        beta = 0.1 * jax.random.normal(next(keys), (ch,), jnp.float32)
        mean = 0.1 * jax.random.normal(next(keys), (ch,), jnp.float32)
        var = jax.random.uniform(next(keys), (ch,), jnp.float32, 0.5, 1.5)
        branch_params.append((w, (gamma, beta, mean, var)))

    out_planes = C
    final_bn = (1.0 + 0.1 * jax.random.normal(next(keys), (out_planes,), jnp.float32),
                0.1 * jax.random.normal(next(keys), (out_planes,), jnp.float32),
                0.1 * jax.random.normal(next(keys), (out_planes,), jnp.float32),
                jax.random.uniform(next(keys), (out_planes,), jnp.float32, 0.5, 1.5))

    out = basic_conv_hs_pallas(x, branch_params, final_bn, s=s, stride=stride,
                               padding=padding, dilation=dilation, relu=True)
    out = jax.block_until_ready(out)

    ref = basic_conv_hs_ref(x, branch_params, final_bn, s=s, stride=stride,
                            padding=padding, dilation=dilation, relu=True)
    assert out.shape == ref.shape == (N, out_planes, H, W), (out.shape, ref.shape)
    # Tolerance reflects the deliberate bf16 MXU-input / inter-branch activation
    # quantization (mirrored in the reference), composed across 3 conv layers.
    err = float(jnp.max(jnp.abs(out - ref)))
    assert jnp.allclose(out, ref, atol=3e-2, rtol=3e-2), err

    print("KERNEL_OK")
</pallas_src>

<mosaic_0001>
module attributes {stable_mosaic.version = 11 : i64} {
  func.func @_matmul_bias_relu_kernel(%arg0: i32, %arg1: memref<512x128xbf16, #tpu.memory_space<vmem>>, %arg2: memref<128x128xbf16, #tpu.memory_space<vmem>>, %arg3: memref<1x128xf32, #tpu.memory_space<vmem>>, %arg4: memref<512x128xbf16, #tpu.memory_space<vmem>>) attributes {dimension_semantics = [#tpu.dimension_semantics<parallel>], iteration_bounds = array<i64: 1>, scalar_prefetch = 0 : i64, scratch_operands = 0 : i64, tpu.core_type = #tpu.core_type<tc>, window_params = [{transform_indices = @transform_0, window_bounds = array<i64: 512, 128>}, {pipeline_mode = #tpu.pipeline_mode<synchronous>, transform_indices = @transform_1, window_bounds = array<i64: 128, 128>}, {pipeline_mode = #tpu.pipeline_mode<synchronous>, transform_indices = @transform_2, window_bounds = array<i64: 1, 128>}, {transform_indices = @transform_3, window_bounds = array<i64: 512, 128>}]} {
    %c0 = arith.constant 0 : index
    %c0_0 = arith.constant 0 : index
    %0 = vector.load %arg1[%c0, %c0_0] : memref<512x128xbf16, #tpu.memory_space<vmem>>, vector<512x128xbf16>
    %c0_1 = arith.constant 0 : index
    %c0_2 = arith.constant 0 : index
    %1 = vector.load %arg2[%c0_1, %c0_2] : memref<128x128xbf16, #tpu.memory_space<vmem>>, vector<128x128xbf16>
    %cst = arith.constant dense<0.000000e+00> : vector<512x128xf32>
    %2 = tpu.matmul %0, %1, %cst {dimension_numbers = #tpu.dot_dimension_numbers<[1], [0], [0], [1], [0, 0, 1, 1], [], []>} : vector<512x128xbf16>, vector<128x128xbf16>, vector<512x128xf32> -> vector<512x128xf32>
    %c0_3 = arith.constant 0 : index
    %c0_4 = arith.constant 0 : index
    %3 = vector.load %arg3[%c0_3, %c0_4] : memref<1x128xf32, #tpu.memory_space<vmem>>, vector<1x128xf32>
    %4 = vector.broadcast %3 : vector<1x128xf32> to vector<512x128xf32>
    %5 = arith.addf %2, %4 : vector<512x128xf32>
    %cst_5 = arith.constant 0.000000e+00 : f32
    %6 = vector.broadcast %cst_5 : f32 to vector<512x128xf32>
    %7 = arith.maximumf %5, %6 : vector<512x128xf32>
    %8 = arith.truncf %7 : vector<512x128xf32> to vector<512x128xbf16>
    %c0_6 = arith.constant 0 : index
    %c0_7 = arith.constant 0 : index
    %9 = vector.load %arg4[%c0_6, %c0_7] : memref<512x128xbf16, #tpu.memory_space<vmem>>, vector<512x128xbf16>
    tpu.vector_store %arg4[%c0_6, %c0_7], %8 {strides = array<i32>} : memref<512x128xbf16, #tpu.memory_space<vmem>>, vector<512x128xbf16>,
    return
  }
  func.func @transform_0(%arg0: i32) -> (i32, i32) {
    %c0_i32 = arith.constant 0 : i32
    %c0_i32_0 = arith.constant 0 : i32
    return %arg0, %c0_i32 : i32, i32
  }
  func.func @transform_1(%arg0: i32) -> (i32, i32) {
    %c0_i32 = arith.constant 0 : i32
    %c0_i32_0 = arith.constant 0 : i32
    %c0_i32_1 = arith.constant 0 : i32
    return %c0_i32, %c0_i32_0 : i32, i32
  }
  func.func @transform_2(%arg0: i32) -> (i32, i32) {
    %c0_i32 = arith.constant 0 : i32
    %c0_i32_0 = arith.constant 0 : i32
    %c0_i32_1 = arith.constant 0 : i32
    return %c0_i32, %c0_i32_0 : i32, i32
  }
  func.func @transform_3(%arg0: i32) -> (i32, i32) {
    %c0_i32 = arith.constant 0 : i32
    %c0_i32_0 = arith.constant 0 : i32
    return %arg0, %c0_i32 : i32, i32
  }
}

</mosaic_0001>

<bundles_post_ra>
// kernel: tpu_custom_call.1
= control target key start
LH: loop header
LB: loop body
LE: loop exit
PB: predicated region body
PF: predicated region fallthrough
CT: control target
= control target key end

     0   :  { %8 = vsyncpa [#allocation3], 0  ;;  %s1814_s0 = inlined_call_operand.hbm [shape: bf16[512,128], index: 0, kind: input, shape index: {}]   ;;  %s1815_s1 = inlined_call_operand.hbm [shape: bf16[128,128], index: 1, kind: input, shape index: {}]   ;;  %s1816_s2 = inlined_call_operand.vmem [shape: f32[1,128], index: 2, kind: input, shape index: {}]   ;;  %s1817_s3 = inlined_call_operand.hbm [shape: bf16[512,128], index: 3, kind: output, shape index: {}]  }
   0x1   :  { %9 = vsyncpa [#allocation6], 0 }
   0x2   :  { %10 = vsyncpa [#allocation4], 0  ;;  %s1675_s12 = smov [#allocation2]   ;;  %s1603_s16 = scalar_lea.hbm %s1814_s0, 4096 }
   0x3   :  { %s16_s13 = sshll.u32 %s1675_s12, 4  ;;  %p1604_p0 = scmp.ne.s32.totalorder %s1814_s0, %s1603_s16  ;;  %s17_s13 = int_to_ptr.vmem [resolvable:$true] %s16_s13 }
   0x4   :  { %p1607_p1 = scmp.lt.u32.totalorder %s1603_s16, %s1814_s0 }
   0x6   :  { %p1609_p2 = pnand %p1607_p1, %p1604_p0 }
   0x8   :  { %1612 = shalt.err (!%p1609_p2)
}
   0x9   :  { %s1613_s21 = scalar_lea.vmem %s17_s13, 4096  ;;  %p1618_p4 = scmp.lt.s32.totalorder %s17_s13, %s17_s13 }
   0xa   :  { %p1614_p3 = scmp.ne.s32.totalorder %s17_s13, %s1613_s21  ;;  %p1619_p5 = scmp.lt.s32.totalorder %s1613_s21, %s1613_s21 }
   0xc   :  { %p1620_p6 = por %p1619_p5, %p1618_p4 }
   0xe   :  { %p1621_p7 = pnand %p1620_p6, %p1614_p3 }
  0x10   :  { %1624 = shalt.err (!%p1621_p7)
}
  0x11   :  { %s1676_s22 = smov 64   ;;  %s1677_s23 = smov 4  }
  0x12   :  { %22 = dma.hbm_to_vmem [thread:$0]  %s1814_s0, 4096, %s17_s13, [#allocation3], %s1676_s22, %s1676_s22, %s1677_s23  }
  0x13   :  { %s1678_s26 = smov [#allocation5]   ;;  %s1625_s30 = scalar_lea.hbm %s1815_s1, 1024 }
  0x14   :  { %s28_s27 = sshll.u32 %s1678_s26, 4  ;;  %p1626_p8 = scmp.ne.s32.totalorder %s1815_s1, %s1625_s30  ;;  %s29_s27 = int_to_ptr.vmem [resolvable:$true] %s28_s27 }
  0x15   :  { %p1629_p9 = scmp.lt.u32.totalorder %s1625_s30, %s1815_s1 }
  0x17   :  { %p1631_p10 = pnand %p1629_p9, %p1626_p8 }
  0x19   :  { %1634 = shalt.err (!%p1631_p10)
}
  0x1a   :  { %s1635_s8 = scalar_lea.vmem %s29_s27, 1024  ;;  %p1640_p12 = scmp.lt.s32.totalorder %s29_s27, %s29_s27 }
  0x1b   :  { %p1636_p11 = scmp.ne.s32.totalorder %s29_s27, %s1635_s8  ;;  %p1641_p13 = scmp.lt.s32.totalorder %s1635_s8, %s1635_s8 }
  0x1d   :  { %p1642_p0 = por %p1641_p13, %p1640_p12 }
  0x1f   :  { %p1643_p1 = pnand %p1642_p0, %p1636_p11 }
  0x21   :  { %1646 = shalt.err (!%p1643_p1)
}
  0x22   :  { %34 = dma.hbm_to_vmem [thread:$0]  %s1815_s1, 1024, %s29_s27, [#allocation6], %s1676_s22, %s1676_s22, %s1677_s23  }
  0x23   :  { %1669 = dma.done.wait [#allocation3], 4096  }
  0x24   :  { %1670 = vsyncadd [#allocation3], 4294963200 }
  0x25   :  { %1671 = dma.done.wait [#allocation6], 1024  }
  0x26   :  { %1672 = vsyncadd [#allocation6], 4294966272  ;;  %v1563_v0 = vld [vmem:[#allocation5] sm:$0xff]   ;;  %v1564_v1 = vld [vmem:[#allocation5 + $0x8] sm:$0xff]  }
  0x27   :  { %1462 = vmatprep.subr.bf16.mxu0 %v1563_v0  ;;  %1542 = vmatprep.subr.bf16.mxu1 %v1563_v0  ;;  %v1565_v2 = vld [vmem:[#allocation5 + $0x10] sm:$0xff]   ;;  %v1566_v3 = vld [vmem:[#allocation5 + $0x18] sm:$0xff]   ;;  %v1571_v4 = vld [vmem:[#allocation2] sm:$0xff]  }
  0x28   :  { %1463 = vmatpush3.bf16.msra.mxu0 %v1563_v0  ;;  %1550 = vmatpush3.bf16.msra.mxu1 %v1563_v0  ;;  %v1572_v5 = vld [vmem:[#allocation2 + $0x80] sm:$0xff]   ;;  %v1568_v7 = vld [vmem:[#allocation5 + $0x28] sm:$0xff]   ;;  %v1569_v8 = vld [vmem:[#allocation5 + $0x30] sm:$0xff]  }
  0x29   :  { %1464 = vmatprep.subr.bf16.mxu0 %v1564_v1  ;;  %1543 = vmatprep.subr.bf16.mxu1 %v1564_v1  ;;  %v1567_v6 = vld [vmem:[#allocation5 + $0x20] sm:$0xff]   ;;  %v1570_v9 = vld [vmem:[#allocation5 + $0x38] sm:$0xff]   ;;  %v1573_v10 = vld [vmem:[#allocation2 + $0x8] sm:$0xff]  }
  0x2a   :  { %1478 = vmatprep.mubr.bf16.mxu0 %v1571_v4  ;;  %1510 = vmatprep.mubr.bf16.mxu1 %v1572_v5  ;;  %v1574_v11 = vld [vmem:[#allocation2 + $0x88] sm:$0xff]   ;;  %v1575_v12 = vld [vmem:[#allocation2 + $0x10] sm:$0xff]   ;;  %v1577_v14 = vld [vmem:[#allocation2 + $0x18] sm:$0xff]  }
  0x2b   :  { %v1576_v13 = vld [vmem:[#allocation2 + $0x90] sm:$0xff]   ;;  %v1578_v15 = vld [vmem:[#allocation2 + $0x98] sm:$0xff]   ;;  %v1579_v16 = vld [vmem:[#allocation2 + $0x20] sm:$0xff]  }
  0x2c   :  { %1465 = vmatpush3.bf16.msra.mxu0 %v1564_v1  ;;  %1551 = vmatpush3.bf16.msra.mxu1 %v1564_v1  ;;  %v1580_v17 = vld [vmem:[#allocation2 + $0xa0] sm:$0xff]   ;;  %v1581_v18 = vld [vmem:[#allocation2 + $0x28] sm:$0xff]   ;;  %v1583_v20 = vld [vmem:[#allocation2 + $0x30] sm:$0xff]  }
  0x2d   :  { %1466 = vmatprep.subr.bf16.mxu0 %v1565_v2  ;;  %1544 = vmatprep.subr.bf16.mxu1 %v1565_v2  ;;  %v1582_v19 = vld [vmem:[#allocation2 + $0xa8] sm:$0xff]   ;;  %v1584_v21 = vld [vmem:[#allocation2 + $0xb0] sm:$0xff]   ;;  %v1585_v22 = vld [vmem:[#allocation2 + $0x38] sm:$0xff]  }
  0x2e   :  { %v1586_v23 = vld [vmem:[#allocation2 + $0xb8] sm:$0xff]   ;;  %v1587_v24 = vld [vmem:[#allocation2 + $0x40] sm:$0xff]   ;;  %v1589_v26 = vld [vmem:[#allocation2 + $0x48] sm:$0xff]  }
  0x2f   :  { %v1588_v25 = vld [vmem:[#allocation2 + $0xc0] sm:$0xff]   ;;  %v1590_v27 = vld [vmem:[#allocation2 + $0xc8] sm:$0xff]   ;;  %v1591_v28 = vld [vmem:[#allocation2 + $0x50] sm:$0xff]  }
  0x30   :  { %1467 = vmatpush3.bf16.msra.mxu0 %v1565_v2  ;;  %1552 = vmatpush3.bf16.msra.mxu1 %v1565_v2  ;;  %v1592_v29 = vld [vmem:[#allocation2 + $0xd0] sm:$0xff]   ;;  %v1593_v30 = vld [vmem:[#allocation2 + $0x58] sm:$0xff]   ;;  %v1595_v32 = vld [vmem:[#allocation2 + $0x60] sm:$0xff]  }
  0x31   :  { %1468 = vmatprep.subr.bf16.mxu0 %v1566_v3  ;;  %1545 = vmatprep.subr.bf16.mxu1 %v1566_v3  ;;  %v1594_v31 = vld [vmem:[#allocation2 + $0xd8] sm:$0xff]   ;;  %v1596_v33 = vld [vmem:[#allocation2 + $0xe0] sm:$0xff]   ;;  %v1597_v34 = vld [vmem:[#allocation2 + $0x68] sm:$0xff]  }
  0x32   :  { %v1598_v35 = vld [vmem:[#allocation2 + $0xe8] sm:$0xff]   ;;  %v1599_v36 = vld [vmem:[#allocation2 + $0x70] sm:$0xff]   ;;  %v1601_v38 = vld [vmem:[#allocation2 + $0x78] sm:$0xff]  }
  0x33   :  { %v1600_v37 = vld [vmem:[#allocation2 + $0xf0] sm:$0xff]   ;;  %v1602_v39 = vld [vmem:[#allocation2 + $0xf8] sm:$0xff]   ;;  %v1733_v40 = vld [vmem:[%s1816_s2] ss:$0 sm:$0xff]  ;;  %s1679_s2 = smov [#allocation7]  }
  0x34   :  { %1469 = vmatpush3.bf16.msra.mxu0 %v1566_v3  ;;  %1553 = vmatpush3.bf16.msra.mxu1 %v1566_v3  ;;  %s1049_s11 = sshll.u32 %s1679_s2, 4  ;;  %s1050_s11 = int_to_ptr.vmem [resolvable:$true] %s1049_s11 }
  0x35   :  { %1470 = vmatprep.subr.bf16.mxu0 %v1567_v6  ;;  %1546 = vmatprep.subr.bf16.mxu1 %v1567_v6  ;;  %s1647_s12 = scalar_lea.vmem %s1050_s11, 4096  ;;  %p1652_p3 = scmp.lt.s32.totalorder %s1050_s11, %s1050_s11 }
  0x36   :  { %p1648_p2 = scmp.ne.s32.totalorder %s1050_s11, %s1647_s12  ;;  %p1653_p4 = scmp.lt.s32.totalorder %s1647_s12, %s1647_s12 }
  0x38   :  { %1471 = vmatpush3.bf16.msra.mxu0 %v1567_v6  ;;  %1554 = vmatpush3.bf16.msra.mxu1 %v1567_v6  ;;  %p1654_p5 = por %p1653_p4, %p1652_p3 }
  0x39   :  { %1472 = vmatprep.subr.bf16.mxu0 %v1568_v7  ;;  %1547 = vmatprep.subr.bf16.mxu1 %v1568_v7 }
  0x3a   :  { %p1655_p6 = pnand %p1654_p5, %p1648_p2 }
  0x3c   :  { %1473 = vmatpush3.bf16.msra.mxu0 %v1568_v7  ;;  %1555 = vmatpush3.bf16.msra.mxu1 %v1568_v7 }
  0x3d   :  { %1474 = vmatprep.subr.bf16.mxu0 %v1569_v8  ;;  %1548 = vmatprep.subr.bf16.mxu1 %v1569_v8 }
  0x40   :  { %1475 = vmatpush3.bf16.msra.mxu0 %v1569_v8  ;;  %1556 = vmatpush3.bf16.msra.mxu1 %v1569_v8 }
  0x41   :  { %1476 = vmatprep.subr.bf16.mxu0 %v1570_v9  ;;  %1549 = vmatprep.subr.bf16.mxu1 %v1570_v9 }
  0x44   :  { %1477 = vmatpush3.bf16.msra.mxu0 %v1570_v9  ;;  %1557 = vmatpush3.bf16.msra.mxu1 %v1570_v9 }
  0x47   :  { %1479 = vmatmul.mubr.bf16.vlgmr.msra.gmra.mrb[0].mxu0 %v1573_v10  ;;  %1511 = vmatmul.mubr.bf16.vlgmr.msra.gmra.mrb[0].mxu1 %v1574_v11 }
  0x48   :  { %1482 = vmatprep.mubr.bf16.mxu0 %v1575_v12  ;;  %1514 = vmatprep.mubr.bf16.mxu1 %v1576_v13 }
  0x4f   :  { %1483 = vmatmul.mubr.bf16.gmra.mrb[4].mxu0 %v1577_v14  ;;  %1515 = vmatmul.mubr.bf16.gmra.mrb[4].mxu1 %v1578_v15 }
  0x50   :  { %1486 = vmatprep.mubr.bf16.mxu0 %v1579_v16  ;;  %1518 = vmatprep.mubr.bf16.mxu1 %v1580_v17 }
  0x57   :  { %1487 = vmatmul.mubr.bf16.gmra.mrb[8].mxu0 %v1581_v18  ;;  %1519 = vmatmul.mubr.bf16.gmra.mrb[8].mxu1 %v1582_v19 }
  0x58   :  { %1490 = vmatprep.mubr.bf16.mxu0 %v1583_v20  ;;  %1522 = vmatprep.mubr.bf16.mxu1 %v1584_v21 }
  0x5f   :  { %1491 = vmatmul.mubr.bf16.gmra.mrb[12].mxu0 %v1585_v22  ;;  %1523 = vmatmul.mubr.bf16.gmra.mrb[12].mxu1 %v1586_v23 }
  0x60   :  { %1494 = vmatprep.mubr.bf16.mxu0 %v1587_v24  ;;  %1526 = vmatprep.mubr.bf16.mxu1 %v1588_v25 }
  0x67   :  { %1495 = vmatmul.mubr.bf16.gmra.mrb[16].mxu0 %v1589_v26  ;;  %1527 = vmatmul.mubr.bf16.gmra.mrb[16].mxu1 %v1590_v27 }
  0x68   :  { %1498 = vmatprep.mubr.bf16.mxu0 %v1591_v28  ;;  %1530 = vmatprep.mubr.bf16.mxu1 %v1592_v29 }
  0x6f   :  { %1499 = vmatmul.mubr.bf16.gmra.mrb[20].mxu0 %v1593_v30  ;;  %1531 = vmatmul.mubr.bf16.gmra.mrb[20].mxu1 %v1594_v31 }
  0x70   :  { %1502 = vmatprep.mubr.bf16.mxu0 %v1595_v32  ;;  %1534 = vmatprep.mubr.bf16.mxu1 %v1596_v33 }
  0x77   :  { %1503 = vmatmul.mubr.bf16.gmra.mrb[24].mxu0 %v1597_v34  ;;  %1535 = vmatmul.mubr.bf16.gmra.mrb[24].mxu1 %v1598_v35 }
  0x78   :  { %1506 = vmatprep.mubr.bf16.mxu0 %v1599_v36  ;;  %1538 = vmatprep.mubr.bf16.mxu1 %v1600_v37 }
  0x7f   :  { %1507 = vmatmul.mubr.bf16.gmra.mrb[28].mxu0 %v1601_v38  ;;  %1539 = vmatmul.mubr.bf16.gmra.mrb[28].mxu1 %v1602_v39 }
 0x11a   :  { %v1480_v41 = vpop.f32.mrb[0].mxu0  ;;  %v1512_v42 = vpop.f32.mrb[0].mxu1 }
 0x11b   :  { %v414_v43 = vadd.f32 %v1480_v41, %v1733_v40  ;;  %v542_v44 = vadd.f32 %v1512_v42, %v1733_v40  ;;  %v405_v45 = vpop.f32.mrb[1].mxu0  ;;  %v533_v46 = vpop.f32.mrb[1].mxu1 }
 0x11c   :  { %v406_v47 = vadd.f32 %v1733_v40, %v405_v45  ;;  %v534_v48 = vadd.f32 %v1733_v40, %v533_v46  ;;  %v1481_v49 = vpop.f32.mrb[2].mxu0  ;;  %v1513_v50 = vpop.f32.mrb[2].mxu1 }
 0x11d   :  { %v417_v51 = vadd.f32 %v1481_v49, %v1733_v40  ;;  %v545_v52 = vadd.f32 %v1513_v50, %v1733_v40  ;;  %v408_v53 = vpop.f32.mrb[3].mxu0  ;;  %v536_v54 = vpop.f32.mrb[3].mxu1  ;;  %v662_v57 = vmax.f32 %v414_v43, 0.0  ;;  %v694_v58 = vmax.f32 %v542_v44, 0.0 }
 0x11e   :  { %v409_v55 = vadd.f32 %v1733_v40, %v408_v53  ;;  %v537_v56 = vadd.f32 %v1733_v40, %v536_v54  ;;  %v660_v61 = vmax.f32 %v406_v47, 0.0  ;;  %v692_v62 = vmax.f32 %v534_v48, 0.0 }
 0x11f   :  { %v663_v59 = vmax.f32 %v417_v51, 0.0  ;;  %v695_v60 = vmax.f32 %v545_v52, 0.0 }
 0x120   :  { %v661_v63 = vmax.f32 %v409_v55, 0.0  ;;  %v693_v0 = vmax.f32 %v537_v56, 0.0 }
 0x121   :  { %v1239_v1 = vpack.c.bf16 %v663_v59, %v662_v57  ;;  %v1319_v2 = vpack.c.bf16 %v695_v60, %v694_v58 }
 0x122   :  { %v1234_v3 = vpack.c.bf16 %v661_v63, %v660_v61  ;;  %v1314_v4 = vpack.c.bf16 %v693_v0, %v692_v62  ;;  %v1484_v5 = vpop.f32.mrb[4].mxu0  ;;  %v1516_v6 = vpop.f32.mrb[4].mxu1 }
 0x123   :  { %1391 = vst [vmem:[#allocation7 + $0x8] sm:$0xff] %v1239_v1   ;;  %1407 = vst [vmem:[#allocation7 + $0x88] sm:$0xff] %v1319_v2   ;;  %v430_v7 = vadd.f32 %v1484_v5, %v1733_v40  ;;  %v558_v8 = vadd.f32 %v1516_v6, %v1733_v40  ;;  %v421_v9 = vpop.f32.mrb[5].mxu0  ;;  %v549_v10 = vpop.f32.mrb[5].mxu1 }
 0x124   :  { %1235 = vst [vmem:[#allocation7] sm:$0xff] %v1234_v3   ;;  %1406 = vst [vmem:[#allocation7 + $0x80] sm:$0xff] %v1314_v4   ;;  %v422_v11 = vadd.f32 %v1733_v40, %v421_v9  ;;  %v550_v12 = vadd.f32 %v1733_v40, %v549_v10  ;;  %v1485_v13 = vpop.f32.mrb[6].mxu0  ;;  %v1517_v14 = vpop.f32.mrb[6].mxu1 }
 0x125   :  { %v433_v15 = vadd.f32 %v1485_v13, %v1733_v40  ;;  %v561_v16 = vadd.f32 %v1517_v14, %v1733_v40  ;;  %v424_v17 = vpop.f32.mrb[7].mxu0  ;;  %v552_v18 = vpop.f32.mrb[7].mxu1  ;;  %v666_v21 = vmax.f32 %v430_v7, 0.0  ;;  %v698_v22 = vmax.f32 %v558_v8, 0.0 }
 0x126   :  { %v425_v19 = vadd.f32 %v1733_v40, %v424_v17  ;;  %v553_v20 = vadd.f32 %v1733_v40, %v552_v18  ;;  %v664_v25 = vmax.f32 %v422_v11, 0.0  ;;  %v696_v26 = vmax.f32 %v550_v12, 0.0 }
 0x127   :  { %v667_v23 = vmax.f32 %v433_v15, 0.0  ;;  %v699_v24 = vmax.f32 %v561_v16, 0.0 }
 0x128   :  { %v665_v27 = vmax.f32 %v425_v19, 0.0  ;;  %v697_v28 = vmax.f32 %v553_v20, 0.0 }
 0x129   :  { %v1249_v29 = vpack.c.bf16 %v667_v23, %v666_v21  ;;  %v1329_v30 = vpack.c.bf16 %v699_v24, %v698_v22 }
 0x12a   :  { %v1244_v31 = vpack.c.bf16 %v665_v27, %v664_v25  ;;  %v1324_v32 = vpack.c.bf16 %v697_v28, %v696_v26  ;;  %v1488_v33 = vpop.f32.mrb[8].mxu0  ;;  %v1520_v34 = vpop.f32.mrb[8].mxu1 }
 0x12b   :  { %1393 = vst [vmem:[#allocation7 + $0x18] sm:$0xff] %v1249_v29   ;;  %1409 = vst [vmem:[#allocation7 + $0x98] sm:$0xff] %v1329_v30   ;;  %v446_v35 = vadd.f32 %v1488_v33, %v1733_v40  ;;  %v574_v36 = vadd.f32 %v1520_v34, %v1733_v40  ;;  %v437_v37 = vpop.f32.mrb[9].mxu0  ;;  %v565_v38 = vpop.f32.mrb[9].mxu1 }
 0x12c   :  { %1392 = vst [vmem:[#allocation7 + $0x10] sm:$0xff] %v1244_v31   ;;  %1408 = vst [vmem:[#allocation7 + $0x90] sm:$0xff] %v1324_v32   ;;  %v438_v39 = vadd.f32 %v1733_v40, %v437_v37  ;;  %v566_v41 = vadd.f32 %v1733_v40, %v565_v38  ;;  %v1489_v42 = vpop.f32.mrb[10].mxu0  ;;  %v1521_v43 = vpop.f32.mrb[10].mxu1 }
 0x12d   :  { %v449_v44 = vadd.f32 %v1489_v42, %v1733_v40  ;;  %v577_v45 = vadd.f32 %v1521_v43, %v1733_v40  ;;  %v440_v46 = vpop.f32.mrb[11].mxu0  ;;  %v568_v47 = vpop.f32.mrb[11].mxu1  ;;  %v670_v50 = vmax.f32 %v446_v35, 0.0  ;;  %v702_v51 = vmax.f32 %v574_v36, 0.0 }
 0x12e   :  { %v441_v48 = vadd.f32 %v1733_v40, %v440_v46  ;;  %v569_v49 = vadd.f32 %v1733_v40, %v568_v47  ;;  %v668_v54 = vmax.f32 %v438_v39, 0.0  ;;  %v700_v55 = vmax.f32 %v566_v41, 0.0 }
 0x12f   :  { %v671_v52 = vmax.f32 %v449_v44, 0.0  ;;  %v703_v53 = vmax.f32 %v577_v45, 0.0 }
 0x130   :  { %v669_v56 = vmax.f32 %v441_v48, 0.0  ;;  %v701_v57 = vmax.f32 %v569_v49, 0.0 }
 0x131   :  { %v1259_v58 = vpack.c.bf16 %v671_v52, %v670_v50  ;;  %v1339_v59 = vpack.c.bf16 %v703_v53, %v702_v51 }
 0x132   :  { %v1254_v60 = vpack.c.bf16 %v669_v56, %v668_v54  ;;  %v1334_v61 = vpack.c.bf16 %v701_v57, %v700_v55  ;;  %v1492_v62 = vpop.f32.mrb[12].mxu0  ;;  %v1524_v63 = vpop.f32.mrb[12].mxu1 }
 0x133   :  { %1395 = vst [vmem:[#allocation7 + $0x28] sm:$0xff] %v1259_v58   ;;  %1411 = vst [vmem:[#allocation7 + $0xa8] sm:$0xff] %v1339_v59   ;;  %v462_v0 = vadd.f32 %v1492_v62, %v1733_v40  ;;  %v590_v1 = vadd.f32 %v1524_v63, %v1733_v40  ;;  %v453_v2 = vpop.f32.mrb[13].mxu0  ;;  %v581_v3 = vpop.f32.mrb[13].mxu1 }
 0x134   :  { %1394 = vst [vmem:[#allocation7 + $0x20] sm:$0xff] %v1254_v60   ;;  %1410 = vst [vmem:[#allocation7 + $0xa0] sm:$0xff] %v1334_v61   ;;  %v454_v4 = vadd.f32 %v1733_v40, %v453_v2  ;;  %v582_v5 = vadd.f32 %v1733_v40, %v581_v3  ;;  %v1493_v6 = vpop.f32.mrb[14].mxu0  ;;  %v1525_v7 = vpop.f32.mrb[14].mxu1 }
 0x135   :  { %v465_v8 = vadd.f32 %v1493_v6, %v1733_v40  ;;  %v593_v9 = vadd.f32 %v1525_v7, %v1733_v40  ;;  %v456_v10 = vpop.f32.mrb[15].mxu0  ;;  %v584_v11 = vpop.f32.mrb[15].mxu1  ;;  %v674_v14 = vmax.f32 %v462_v0, 0.0  ;;  %v706_v15 = vmax.f32 %v590_v1, 0.0 }
 0x136   :  { %v457_v12 = vadd.f32 %v1733_v40, %v456_v10  ;;  %v585_v13 = vadd.f32 %v1733_v40, %v584_v11  ;;  %v672_v18 = vmax.f32 %v454_v4, 0.0  ;;  %v704_v19 = vmax.f32 %v582_v5, 0.0 }
 0x137   :  { %v675_v16 = vmax.f32 %v465_v8, 0.0  ;;  %v707_v17 = vmax.f32 %v593_v9, 0.0 }
 0x138   :  { %v673_v20 = vmax.f32 %v457_v12, 0.0  ;;  %v705_v21 = vmax.f32 %v585_v13, 0.0 }
 0x139   :  { %v1269_v22 = vpack.c.bf16 %v675_v16, %v674_v14  ;;  %v1349_v23 = vpack.c.bf16 %v707_v17, %v706_v15 }
 0x13a   :  { %v1264_v24 = vpack.c.bf16 %v673_v20, %v672_v18  ;;  %v1344_v25 = vpack.c.bf16 %v705_v21, %v704_v19  ;;  %v1496_v26 = vpop.f32.mrb[16].mxu0  ;;  %v1528_v27 = vpop.f32.mrb[16].mxu1 }
 0x13b   :  { %1397 = vst [vmem:[#allocation7 + $0x38] sm:$0xff] %v1269_v22   ;;  %1413 = vst [vmem:[#allocation7 + $0xb8] sm:$0xff] %v1349_v23   ;;  %v478_v28 = vadd.f32 %v1496_v26, %v1733_v40  ;;  %v606_v29 = vadd.f32 %v1528_v27, %v1733_v40  ;;  %v469_v30 = vpop.f32.mrb[17].mxu0  ;;  %v597_v31 = vpop.f32.mrb[17].mxu1 }
 0x13c   :  { %1396 = vst [vmem:[#allocation7 + $0x30] sm:$0xff] %v1264_v24   ;;  %1412 = vst [vmem:[#allocation7 + $0xb0] sm:$0xff] %v1344_v25   ;;  %v470_v32 = vadd.f32 %v1733_v40, %v469_v30  ;;  %v598_v33 = vadd.f32 %v1733_v40, %v597_v31  ;;  %v1497_v34 = vpop.f32.mrb[18].mxu0  ;;  %v1529_v35 = vpop.f32.mrb[18].mxu1 }
 0x13d   :  { %v481_v36 = vadd.f32 %v1497_v34, %v1733_v40  ;;  %v609_v37 = vadd.f32 %v1529_v35, %v1733_v40  ;;  %v472_v38 = vpop.f32.mrb[19].mxu0  ;;  %v600_v39 = vpop.f32.mrb[19].mxu1  ;;  %v678_v43 = vmax.f32 %v478_v28, 0.0  ;;  %v710_v44 = vmax.f32 %v606_v29, 0.0 }
 0x13e   :  { %v473_v41 = vadd.f32 %v1733_v40, %v472_v38  ;;  %v601_v42 = vadd.f32 %v1733_v40, %v600_v39  ;;  %v676_v47 = vmax.f32 %v470_v32, 0.0  ;;  %v708_v48 = vmax.f32 %v598_v33, 0.0 }
 0x13f   :  { %v679_v45 = vmax.f32 %v481_v36, 0.0  ;;  %v711_v46 = vmax.f32 %v609_v37, 0.0 }
 0x140   :  { %v677_v49 = vmax.f32 %v473_v41, 0.0  ;;  %v709_v50 = vmax.f32 %v601_v42, 0.0 }
 0x141   :  { %v1279_v51 = vpack.c.bf16 %v679_v45, %v678_v43  ;;  %v1359_v52 = vpack.c.bf16 %v711_v46, %v710_v44 }
 0x142   :  { %v1274_v53 = vpack.c.bf16 %v677_v49, %v676_v47  ;;  %v1354_v54 = vpack.c.bf16 %v709_v50, %v708_v48  ;;  %v1500_v55 = vpop.f32.mrb[20].mxu0  ;;  %v1532_v56 = vpop.f32.mrb[20].mxu1 }
 0x143   :  { %1399 = vst [vmem:[#allocation7 + $0x48] sm:$0xff] %v1279_v51   ;;  %1415 = vst [vmem:[#allocation7 + $0xc8] sm:$0xff] %v1359_v52   ;;  %v494_v57 = vadd.f32 %v1500_v55, %v1733_v40  ;;  %v622_v58 = vadd.f32 %v1532_v56, %v1733_v40  ;;  %v485_v59 = vpop.f32.mrb[21].mxu0  ;;  %v613_v60 = vpop.f32.mrb[21].mxu1 }
 0x144   :  { %1398 = vst [vmem:[#allocation7 + $0x40] sm:$0xff] %v1274_v53   ;;  %1414 = vst [vmem:[#allocation7 + $0xc0] sm:$0xff] %v1354_v54   ;;  %v486_v61 = vadd.f32 %v1733_v40, %v485_v59  ;;  %v614_v62 = vadd.f32 %v1733_v40, %v613_v60  ;;  %v1501_v63 = vpop.f32.mrb[22].mxu0  ;;  %v1533_v0 = vpop.f32.mrb[22].mxu1 }
 0x145   :  { %v497_v1 = vadd.f32 %v1501_v63, %v1733_v40  ;;  %v625_v2 = vadd.f32 %v1533_v0, %v1733_v40  ;;  %v488_v3 = vpop.f32.mrb[23].mxu0  ;;  %v616_v4 = vpop.f32.mrb[23].mxu1  ;;  %v682_v7 = vmax.f32 %v494_v57, 0.0  ;;  %v714_v8 = vmax.f32 %v622_v58, 0.0 }
 0x146   :  { %v489_v5 = vadd.f32 %v1733_v40, %v488_v3  ;;  %v617_v6 = vadd.f32 %v1733_v40, %v616_v4  ;;  %v680_v11 = vmax.f32 %v486_v61, 0.0  ;;  %v712_v12 = vmax.f32 %v614_v62, 0.0 }
 0x147   :  { %v683_v9 = vmax.f32 %v497_v1, 0.0  ;;  %v715_v10 = vmax.f32 %v625_v2, 0.0 }
 0x148   :  { %v681_v13 = vmax.f32 %v489_v5, 0.0  ;;  %v713_v14 = vmax.f32 %v617_v6, 0.0 }
 0x149   :  { %v1289_v15 = vpack.c.bf16 %v683_v9, %v682_v7  ;;  %v1369_v16 = vpack.c.bf16 %v715_v10, %v714_v8 }
 0x14a   :  { %v1284_v17 = vpack.c.bf16 %v681_v13, %v680_v11  ;;  %v1364_v18 = vpack.c.bf16 %v713_v14, %v712_v12  ;;  %v1504_v19 = vpop.f32.mrb[24].mxu0  ;;  %v1536_v20 = vpop.f32.mrb[24].mxu1 }
 0x14b   :  { %1401 = vst [vmem:[#allocation7 + $0x58] sm:$0xff] %v1289_v15   ;;  %1417 = vst [vmem:[#allocation7 + $0xd8] sm:$0xff] %v1369_v16   ;;  %v510_v21 = vadd.f32 %v1504_v19, %v1733_v40  ;;  %v638_v22 = vadd.f32 %v1536_v20, %v1733_v40  ;;  %v501_v23 = vpop.f32.mrb[25].mxu0  ;;  %v629_v24 = vpop.f32.mrb[25].mxu1 }
 0x14c   :  { %1400 = vst [vmem:[#allocation7 + $0x50] sm:$0xff] %v1284_v17   ;;  %1416 = vst [vmem:[#allocation7 + $0xd0] sm:$0xff] %v1364_v18   ;;  %v502_v25 = vadd.f32 %v1733_v40, %v501_v23  ;;  %v630_v26 = vadd.f32 %v1733_v40, %v629_v24  ;;  %v1505_v27 = vpop.f32.mrb[26].mxu0  ;;  %v1537_v28 = vpop.f32.mrb[26].mxu1 }
 0x14d   :  { %v513_v29 = vadd.f32 %v1505_v27, %v1733_v40  ;;  %v641_v30 = vadd.f32 %v1537_v28, %v1733_v40  ;;  %v504_v31 = vpop.f32.mrb[27].mxu0  ;;  %v632_v32 = vpop.f32.mrb[27].mxu1  ;;  %v686_v35 = vmax.f32 %v510_v21, 0.0  ;;  %v718_v36 = vmax.f32 %v638_v22, 0.0 }
 0x14e   :  { %v505_v33 = vadd.f32 %v1733_v40, %v504_v31  ;;  %v633_v34 = vadd.f32 %v1733_v40, %v632_v32  ;;  %v684_v39 = vmax.f32 %v502_v25, 0.0  ;;  %v716_v41 = vmax.f32 %v630_v26, 0.0 }
 0x14f   :  { %v687_v37 = vmax.f32 %v513_v29, 0.0  ;;  %v719_v38 = vmax.f32 %v641_v30, 0.0 }
 0x150   :  { %v685_v42 = vmax.f32 %v505_v33, 0.0  ;;  %v717_v43 = vmax.f32 %v633_v34, 0.0 }
 0x151   :  { %v1299_v44 = vpack.c.bf16 %v687_v37, %v686_v35  ;;  %v1379_v45 = vpack.c.bf16 %v719_v38, %v718_v36 }
 0x152   :  { %v1294_v46 = vpack.c.bf16 %v685_v42, %v684_v39  ;;  %v1374_v47 = vpack.c.bf16 %v717_v43, %v716_v41  ;;  %v1508_v48 = vpop.f32.mrb[28].mxu0  ;;  %v1540_v49 = vpop.f32.mrb[28].mxu1 }
 0x153   :  { %1403 = vst [vmem:[#allocation7 + $0x68] sm:$0xff] %v1299_v44   ;;  %1419 = vst [vmem:[#allocation7 + $0xe8] sm:$0xff] %v1379_v45   ;;  %v526_v50 = vadd.f32 %v1508_v48, %v1733_v40  ;;  %v654_v51 = vadd.f32 %v1540_v49, %v1733_v40  ;;  %v517_v52 = vpop.f32.mrb[29].mxu0  ;;  %v645_v53 = vpop.f32.mrb[29].mxu1 }
 0x154   :  { %1402 = vst [vmem:[#allocation7 + $0x60] sm:$0xff] %v1294_v46   ;;  %1418 = vst [vmem:[#allocation7 + $0xe0] sm:$0xff] %v1374_v47   ;;  %v518_v54 = vadd.f32 %v1733_v40, %v517_v52  ;;  %v646_v55 = vadd.f32 %v1733_v40, %v645_v53  ;;  %v1509_v56 = vpop.f32.mrb[30].mxu0  ;;  %v1541_v57 = vpop.f32.mrb[30].mxu1 }
 0x155   :  { %v529_v58 = vadd.f32 %v1509_v56, %v1733_v40  ;;  %v657_v59 = vadd.f32 %v1541_v57, %v1733_v40  ;;  %v520_v60 = vpop.f32.mrb[31].mxu0  ;;  %v648_v61 = vpop.f32.mrb[31].mxu1  ;;  %v690_v0 = vmax.f32 %v526_v50, 0.0  ;;  %v722_v1 = vmax.f32 %v654_v51, 0.0 }
 0x156   :  { %v521_v62 = vadd.f32 %v1733_v40, %v520_v60  ;;  %v649_v63 = vadd.f32 %v1733_v40, %v648_v61  ;;  %v688_v4 = vmax.f32 %v518_v54, 0.0  ;;  %v720_v5 = vmax.f32 %v646_v55, 0.0 }
 0x157   :  { %v691_v2 = vmax.f32 %v529_v58, 0.0  ;;  %v723_v3 = vmax.f32 %v657_v59, 0.0 }
 0x158   :  { %v689_v6 = vmax.f32 %v521_v62, 0.0  ;;  %v721_v7 = vmax.f32 %v649_v63, 0.0 }
 0x159   :  { %v1309_v8 = vpack.c.bf16 %v691_v2, %v690_v0  ;;  %v1389_v9 = vpack.c.bf16 %v723_v3, %v722_v1 }
 0x15a   :  { %v1304_v10 = vpack.c.bf16 %v689_v6, %v688_v4  ;;  %v1384_v11 = vpack.c.bf16 %v721_v7, %v720_v5 }
 0x15b   :  { %1405 = vst [vmem:[#allocation7 + $0x78] sm:$0xff] %v1309_v8   ;;  %1421 = vst [vmem:[#allocation7 + $0xf8] sm:$0xff] %v1389_v9  }
 0x15c   :  { %1404 = vst [vmem:[#allocation7 + $0x70] sm:$0xff] %v1304_v10   ;;  %1420 = vst [vmem:[#allocation7 + $0xf0] sm:$0xff] %v1384_v11  }
 0x15d   :  { %1658 = shalt.err (!%p1655_p6)
}
 0x15e   :  { %s1659_s15 = scalar_lea.hbm %s1817_s3, 4096 }
 0x15f   :  { %p1660_p7 = scmp.ne.s32.totalorder %s1817_s3, %s1659_s15  ;;  %p1663_p8 = scmp.lt.u32.totalorder %s1659_s15, %s1817_s3 }
 0x161   :  { %p1665_p9 = pnand %p1663_p8, %p1660_p7 }
 0x163   :  { %1668 = shalt.err (!%p1665_p9)
}
 0x164   :  { %1055 = dma.vmem_to_hbm [thread:$0]  %s1050_s11, 4096, %s1817_s3, [#allocation4], %s1676_s22, %s1676_s22, %s1677_s23  }
 0x165   :  { %1673 = dma.done.wait [#allocation4], 4096  }
 0x166   :  { %1674 = vsyncadd [#allocation4], 4294963200 }
 0x167   :  { %1059 = vsyncpa [#allocation3], 1 }
 0x168   :  { %1060 = vsyncpa [#allocation6], 1 }
 0x169   :  { %1061 = vsyncpa [#allocation4], 1 }

</bundles_post_ra>
